<compile_context>
chip_gen: v6e
topology: v6e:2x2x1
jax: 0.10.0
libtpu: 0.0.40
codegen_flags: <defaults>
</compile_context>

<pallas_src>
import functools
import math

import jax
import jax.numpy as jnp
import numpy as np
from jax.experimental import pallas as pl
from jax.experimental.pallas import tpu as pltpu


def _round_up(x: int, m: int) -> int:
    return ((x + m - 1) // m) * m


def ffm_kernel(idx_ref, w_ref, out_ref):
    """idx_ref: (1, 1, F*TB) int32 (field-major, batch-minor);
    w_ref:   (F*D, V) f32  (table t transposed in rows [t*D, (t+1)*D));
    out_ref: (P*D, TB) f32 (pair p transposed in rows [p*D, (p+1)*D))."""
    FD, V = w_ref.shape
    PD, TB = out_ref.shape
    FTB = idx_ref.shape[-1]
    F = FTB // TB
    D = FD // F

    # --- one-hot: a single iota + a single compare (field-major lanes) ------
    idx = idx_ref[0]                                          # (1, F*TB) int32
    iota_v = jax.lax.broadcasted_iota(jnp.int32, (V, FTB), 0)
    oh_t = (iota_v == idx).astype(jnp.float32)                # (V, F*TB)

    # --- one fused gather-matmul on the MXU ---------------------------------
    # g[t*D + d, f*TB + b] = weights[t, idx[b, f], d] = xs[t][b, f, d]
    g = jnp.dot(w_ref[...], oh_t, preferred_element_type=jnp.float32)

    # --- pair slabs: all slices are sublane-(D) and lane-(TB) aligned --------
    # pair(i, j) = xs[j][:, i] * xs[i][:, j]
    a_blocks = []
    b_blocks = []
    for i in range(F - 1):
        for j in range(i + 1, F):
            a_blocks.append(g[j * D:(j + 1) * D, i * TB:(i + 1) * TB])
            b_blocks.append(g[i * D:(i + 1) * D, j * TB:(j + 1) * TB])
    a = jnp.concatenate(a_blocks, axis=0)                     # (P*D, TB)
    b = jnp.concatenate(b_blocks, axis=0)                     # (P*D, TB)

    # One lane-dense multiply + one lane-dense store (last dim = TB % 128 == 0).
    out_ref[...] = a * b


@functools.partial(jax.jit, static_argnames=("block_b",))
def ffm_forward(idx, weights, *, block_b=512):
    """idx: (B, F) int32 with offsets already applied; weights: (F, V, D) f32.

    Returns (B, P, D) float32 with pair order matching torch.stack(..., dim=1).
    """
    B, F = idx.shape
    Fw, V, D = weights.shape
    assert Fw == F
    P = F * (F - 1) // 2

    # Transposed, table-concatenated weights: (F*D, V); rows [t*D,(t+1)*D) = table t^T.
    w_t = jnp.transpose(weights, (0, 2, 1)).reshape(F * D, V)

    # Batch tile: multiple of 128 so every lane slice / the final store is
    # vreg-aligned; as large as possible to amortize per-grid-step overhead.
    TB = _round_up(min(max(block_b, 128), _round_up(B, 128)), 128)
    B_pad = _round_up(B, TB)
    nt = B_pad // TB
    if B_pad != B:
        idx = jnp.pad(idx, ((0, B_pad - B), (0, 0)))  # index 0 is always valid

    # Tile-major / field-major / batch-minor index layout, pre-flattened so the
    # kernel needs exactly one compare and zero concats to build the one-hot.
    idx_t = (idx.astype(jnp.int32)
             .reshape(nt, TB, F)
             .transpose(0, 2, 1)            # (nt, F, TB)
             .reshape(nt, 1, F * TB))       # (nt, 1, F*TB)

    # Explicit VMEM budget: weight block (x2 pipeline buffers) + 2x(idx + out
    # blocks) + in-kernel intermediates (one-hot, G^T, two pair slabs) + slack.
    w_bytes = F * D * V * 4
    idx_bytes = F * TB * 4
    out_bytes = P * D * TB * 4
    interm_bytes = (V * F * TB + F * D * F * TB + 2 * P * D * TB) * 4
    vmem_limit = int(min(2 * (w_bytes + idx_bytes + out_bytes)
                         + interm_bytes + (4 << 20), 64 << 20))

    out_t = pl.pallas_call(
        ffm_kernel,
        out_shape=jax.ShapeDtypeStruct((P * D, B_pad), jnp.float32),
        grid=(nt,),
        in_specs=[
            pl.BlockSpec((1, 1, F * TB), lambda i: (i, 0, 0)),
            # Constant index_map: the weight tile stays VMEM-resident across
            # all batch-grid steps (no re-DMA).
            pl.BlockSpec((F * D, V), lambda i: (0, 0)),
        ],
        out_specs=pl.BlockSpec((P * D, TB), lambda i: (0, i)),
        compiler_params=pltpu.CompilerParams(
            dimension_semantics=("parallel",),   # shards batch tiles on v7x only
            vmem_limit_bytes=vmem_limit),
    )(idx_t, w_t)

    # Layout plumbing back to (B, P, D): out_t[p*D + d, b] = pair_p[b, d].
    return out_t[:, :B].reshape(P, D, B).transpose(2, 0, 1)


def reference_ffm(idx, weights):
    """Pure-JAX reference (mirrors the PyTorch forward)."""
    F = idx.shape[1]
    xs = [weights[t][idx] for t in range(F)]          # each (B, F, D)
    pairs = []
    for i in range(F - 1):
        for j in range(i + 1, F):
            pairs.append(xs[j][:, i] * xs[i][:, j])
    return jnp.stack(pairs, axis=1)


if __name__ == "__main__":
    # Small, deterministic problem consistent with the module's __init__.
    field_dims = np.array([3, 4, 5, 4], dtype=np.int64)
    num_fields = len(field_dims)              # F = 4
    embed_dim = 8                             # D = 8
    vocab = int(field_dims.sum())             # V = 16
    batch = 384                               # B (exercises padding + tiling)

    key = jax.random.PRNGKey(0)
    k_w, k_x = jax.random.split(key)

    # Xavier-uniform init for each embedding table (shape (V, D)).
    bound = math.sqrt(6.0 / (vocab + embed_dim))
    weights = jax.random.uniform(
        k_w, (num_fields, vocab, embed_dim),
        minval=-bound, maxval=bound, dtype=jnp.float32)

    # Per-field categorical indices in [0, field_dims[f]).
    cols = []
    ks = jax.random.split(k_x, num_fields)
    for f in range(num_fields):
        cols.append(jax.random.randint(ks[f], (batch,), 0, int(field_dims[f]),
                                       dtype=jnp.int32))
    raw_idx = jnp.stack(cols, axis=1)                      # (B, F)

    # Add per-field offsets (glue, mirrors `x + offsets` in the module).
    offsets = jnp.asarray(
        np.concatenate([[0], np.cumsum(field_dims)[:-1]]).astype(np.int32))
    idx = raw_idx + offsets[None, :]                       # (B, F) int32

    ref = reference_ffm(idx, weights)

    # Default (single large tile) and small-tile (multi-step grid + padding).
    out_big = jax.block_until_ready(ffm_forward(idx, weights))
    out_small = jax.block_until_ready(ffm_forward(idx, weights, block_b=128))

    np.testing.assert_allclose(np.asarray(out_big), np.asarray(ref),
                               rtol=1e-5, atol=1e-5)
    np.testing.assert_allclose(np.asarray(out_small), np.asarray(ref),
                               rtol=1e-5, atol=1e-5)

    print("KERNEL_OK")
</pallas_src>

<mosaic_0001>
module attributes {stable_mosaic.version = 11 : i64} {
  func.func @ffm_kernel(%arg0: i32, %arg1: memref<1x1x1536xi32, #tpu.memory_space<vmem>>, %arg2: memref<32x16xf32, #tpu.memory_space<vmem>>, %arg3: memref<48x384xf32, #tpu.memory_space<vmem>>) attributes {dimension_semantics = [#tpu.dimension_semantics<parallel>], iteration_bounds = array<i64: 1>, scalar_prefetch = 0 : i64, scratch_operands = 0 : i64, tpu.core_type = #tpu.core_type<tc>, window_params = [{transform_indices = @transform_0, window_bounds = array<i64: 1, 1, 1536>}, {pipeline_mode = #tpu.pipeline_mode<synchronous>, transform_indices = @transform_1, window_bounds = array<i64: 32, 16>}, {transform_indices = @transform_2, window_bounds = array<i64: 48, 384>}]} {
    %c0 = arith.constant 0 : index
    %c0_0 = arith.constant 0 : index
    %c0_1 = arith.constant 0 : index
    %0 = vector.load %arg1[%c0, %c0_0, %c0_1] : memref<1x1x1536xi32, #tpu.memory_space<vmem>>, vector<1x1x1536xi32>
    %1 = vector.shape_cast %0 : vector<1x1x1536xi32> to vector<1x1536xi32>
    %2 = tpu.iota {dimensions = array<i32: 0>} : vector<16x1536xi32>
    %3 = vector.broadcast %1 : vector<1x1536xi32> to vector<16x1536xi32>
    %4 = arith.cmpi eq, %2, %3 : vector<16x1536xi32>
    %5 = arith.extui %4 : vector<16x1536xi1> to vector<16x1536xi32>
    %6 = arith.sitofp %5 : vector<16x1536xi32> to vector<16x1536xf32>
    %c0_2 = arith.constant 0 : index
    %c0_3 = arith.constant 0 : index
    %7 = vector.load %arg2[%c0_2, %c0_3] : memref<32x16xf32, #tpu.memory_space<vmem>>, vector<32x16xf32>
    %cst = arith.constant dense<0.000000e+00> : vector<32x1536xf32>
    %8 = tpu.matmul %7, %6, %cst {dimension_numbers = #tpu.dot_dimension_numbers<[1], [0], [0], [1], [0, 0, 1, 1], [], []>} : vector<32x16xf32>, vector<16x1536xf32>, vector<32x1536xf32> -> vector<32x1536xf32>
    %9 = vector.extract_strided_slice %8 {offsets = [8, 0], sizes = [8, 384], strides = [1, 1]} : vector<32x1536xf32> to vector<8x384xf32>
    %10 = vector.extract_strided_slice %8 {offsets = [0, 384], sizes = [8, 384], strides = [1, 1]} : vector<32x1536xf32> to vector<8x384xf32>
    %11 = vector.extract_strided_slice %8 {offsets = [16, 0], sizes = [8, 384], strides = [1, 1]} : vector<32x1536xf32> to vector<8x384xf32>
    %12 = vector.extract_strided_slice %8 {offsets = [0, 768], sizes = [8, 384], strides = [1, 1]} : vector<32x1536xf32> to vector<8x384xf32>
    %13 = vector.extract_strided_slice %8 {offsets = [24, 0], sizes = [8, 384], strides = [1, 1]} : vector<32x1536xf32> to vector<8x384xf32>
    %14 = vector.extract_strided_slice %8 {offsets = [0, 1152], sizes = [8, 384], strides = [1, 1]} : vector<32x1536xf32> to vector<8x384xf32>
    %15 = vector.extract_strided_slice %8 {offsets = [16, 384], sizes = [8, 384], strides = [1, 1]} : vector<32x1536xf32> to vector<8x384xf32>
    %16 = vector.extract_strided_slice %8 {offsets = [8, 768], sizes = [8, 384], strides = [1, 1]} : vector<32x1536xf32> to vector<8x384xf32>
    %17 = vector.extract_strided_slice %8 {offsets = [24, 384], sizes = [8, 384], strides = [1, 1]} : vector<32x1536xf32> to vector<8x384xf32>
    %18 = vector.extract_strided_slice %8 {offsets = [8, 1152], sizes = [8, 384], strides = [1, 1]} : vector<32x1536xf32> to vector<8x384xf32>
    %19 = vector.extract_strided_slice %8 {offsets = [24, 768], sizes = [8, 384], strides = [1, 1]} : vector<32x1536xf32> to vector<8x384xf32>
    %20 = vector.extract_strided_slice %8 {offsets = [16, 1152], sizes = [8, 384], strides = [1, 1]} : vector<32x1536xf32> to vector<8x384xf32>
    %21 = tpu.concatenate %9, %11, %13, %15, %17, %19 in 0 : vector<8x384xf32>, vector<8x384xf32>, vector<8x384xf32>, vector<8x384xf32>, vector<8x384xf32>, vector<8x384xf32> -> vector<48x384xf32>
    %22 = tpu.concatenate %10, %12, %14, %16, %18, %20 in 0 : vector<8x384xf32>, vector<8x384xf32>, vector<8x384xf32>, vector<8x384xf32>, vector<8x384xf32>, vector<8x384xf32> -> vector<48x384xf32>
    %23 = arith.mulf %21, %22 : vector<48x384xf32>
    %c0_4 = arith.constant 0 : index
    %c0_5 = arith.constant 0 : index
    %24 = vector.load %arg3[%c0_4, %c0_5] : memref<48x384xf32, #tpu.memory_space<vmem>>, vector<48x384xf32>
    tpu.vector_store %arg3[%c0_4, %c0_5], %23 {strides = array<i32>} : memref<48x384xf32, #tpu.memory_space<vmem>>, vector<48x384xf32>,
    return
  }
  func.func @transform_0(%arg0: i32) -> (i32, i32, i32) {
    %c0_i32 = arith.constant 0 : i32
    %c0_i32_0 = arith.constant 0 : i32
    %c0_i32_1 = arith.constant 0 : i32
    return %arg0, %c0_i32, %c0_i32_0 : i32, i32, i32
  }
  func.func @transform_1(%arg0: i32) -> (i32, i32) {
    %c0_i32 = arith.constant 0 : i32
    %c0_i32_0 = arith.constant 0 : i32
    %c0_i32_1 = arith.constant 0 : i32
    return %c0_i32, %c0_i32_0 : i32, i32
  }
  func.func @transform_2(%arg0: i32) -> (i32, i32) {
    %c0_i32 = arith.constant 0 : i32
    %c0_i32_0 = arith.constant 0 : i32
    return %c0_i32, %arg0 : i32, i32
  }
}

</mosaic_0001>

<bundles_post_ra>
// kernel: ffm_forward.1
= control target key start
LH: loop header
LB: loop body
LE: loop exit
PB: predicated region body
PF: predicated region fallthrough
CT: control target
= control target key end

     0   :  { %7 = vsyncpa [#allocation3], 0  ;;  %s1035_s0 = inlined_call_operand.vmem [shape: s32[1,1,1536], index: 0, kind: input, shape index: {}]   ;;  %s1036_s1 = inlined_call_operand.hbm [shape: f32[32,16], index: 1, kind: input, shape index: {}]   ;;  %s1037_s2 = inlined_call_operand.hbm [shape: f32[48,384], index: 2, kind: output, shape index: {}]  }
   0x1   :  { %8 = vsyncpa [#allocation4], 0  ;;  %s867_s9 = smov [#allocation2]  }
   0x2   :  { %s16_s10 = sshll.u32 %s867_s9, 4  ;;  %s17_s10 = int_to_ptr.vmem [resolvable:$true] %s16_s10 }
   0x3   :  { %s831_s11 = scalar_lea.vmem %s17_s10, 512  ;;  %p836_p1 = scmp.lt.s32.totalorder %s17_s10, %s17_s10 }
   0x4   :  { %p832_p0 = scmp.ne.s32.totalorder %s17_s10, %s831_s11  ;;  %p837_p2 = scmp.lt.s32.totalorder %s831_s11, %s831_s11 }
   0x6   :  { %p838_p3 = por %p837_p2, %p836_p1 }
   0x8   :  { %p839_p4 = pnand %p838_p3, %p832_p0 }
   0xa   :  { %842 = shalt.err (!%p839_p4)
}
   0xb   :  { %s868_s12 = smov 128   ;;  %s869_s13 = smov 8  }
   0xc   :  { %22 = dma.hbm_to_vmem [thread:$0]  %s1036_s1, 512, %s17_s10, [#allocation3], %s868_s12, %s868_s12, %s869_s13  }
   0xd   :  { %863 = dma.done.wait [#allocation3], 512  }
   0xe   :  { %864 = vsyncadd [#allocation3], 4294966784  ;;  %v28_v0 = vlaneseq  ;;  %v870_v1 = vmov 0.0   ;;  %v26_v12 = vld [vmem:[%s1035_s0] sm:$0xff]  ;;  %v871_v21 = vmov 1.0   ;;  %vm155_vm8 = vcmask 130048  }
   0xf   :  { %232 = vmatprep.mubr.f32.mxu0 %v870_v1  ;;  %319 = vmatprep.mubr.f32.mxu1 %v870_v1  ;;  %v927_v22 = vld [vmem:[#allocation2] sm:$0xff]  ;;  %v27_v23 = vld [vmem:[%s1035_s0 + $0x8] sm:$0xf]  ;;  %v153_v27 = vld [vmem:[#allocation2 + $0x10] sm:$0xff]  ;;  %s872_s0 = smov [#allocation5]  }
  0x10   :  { %v895_v2 = vshrl.u32 %v28_v0, 7  ;;  %v946_v24 = vld [vmem:[#allocation2 + $0x8] sm:$0xff]  ;;  %v154_v28 = vld [vmem:[#allocation2 + $0x18] sm:$0xff]  ;;  %s731_s19 = sshll.u32 %s872_s0, 4  ;;  %s732_s19 = int_to_ptr.vmem [resolvable:$true] %s731_s19 }
  0x11   :  { %s843_s20 = scalar_lea.vmem %s732_s19, 2304  ;;  %p848_p6 = scmp.lt.s32.totalorder %s732_s19, %s732_s19 }
  0x12   :  { %v37_v3 = vsub.s32 1, %v895_v2  ;;  %v45_v4 = vsub.s32 3, %v895_v2  ;;  %v33_v5 = vsub.s32 0, %v895_v2  ;;  %v41_v6 = vsub.s32 2, %v895_v2  ;;  %p844_p5 = scmp.ne.s32.totalorder %s732_s19, %s843_s20  ;;  %p849_p7 = scmp.lt.s32.totalorder %s843_s20, %s843_s20 }
  0x13   :  { %v53_v7 = vsub.s32 5, %v895_v2  ;;  %v49_v8 = vsub.s32 4, %v895_v2  ;;  %v61_v9 = vsub.s32 7, %v895_v2  ;;  %v905_v10 = vadd.s32 8, %v895_v2 }
  0x14   :  { %v57_v11 = vsub.s32 6, %v895_v2  ;;  %v38_v13 = vrot.slane %v26_v12, %v37_v3  ;;  %v46_v14 = vrot.slane %v26_v12, %v45_v4  ;;  %v34_v15 = vrot.slane %v26_v12, %v33_v5  ;;  %p850_p8 = por %p849_p7, %p848_p6 }
  0x15   :  { %v42_v16 = vrot.slane %v26_v12, %v41_v6  ;;  %v54_v17 = vrot.slane %v26_v12, %v53_v7  ;;  %v50_v18 = vrot.slane %v26_v12, %v49_v8  ;;  %v62_v19 = vrot.slane %v26_v12, %v61_v9 }
  0x16   :  { %v58_v20 = vrot.slane %v26_v12, %v57_v11  ;;  %vm92_vm0 = vcmp.eq.s32.totalorder %v905_v10, %v38_v13  ;;  %vm94_vm1 = vcmp.eq.s32.totalorder %v905_v10, %v46_v14  ;;  %vm91_vm2 = vcmp.eq.s32.totalorder %v905_v10, %v34_v15  ;;  %p851_p9 = pnand %p850_p8, %p844_p5 }
  0x17   :  { %vm93_vm3 = vcmp.eq.s32.totalorder %v905_v10, %v42_v16  ;;  %767 = vmatprep.subr.msk.mxu0 %vm92_vm0, %v871_v21  ;;  %775 = vmatprep.subr.msk.mxu1 %vm94_vm1, %v871_v21  ;;  %vm80_vm4 = vcmp.eq.s32.totalorder %v895_v2, %v38_v13  ;;  %vm82_vm5 = vcmp.eq.s32.totalorder %v895_v2, %v46_v14 }
  0x18   :  { %vm79_vm6 = vcmp.eq.s32.totalorder %v895_v2, %v34_v15  ;;  %768 = vmatpush1.msk.msra.mxu0 %vm91_vm2, %v871_v21  ;;  %776 = vmatpush1.msk.msra.mxu1 %vm93_vm3, %v871_v21  ;;  %vm81_vm7 = vcmp.eq.s32.totalorder %v895_v2, %v42_v16  ;;  %vm96_vm9 = vcmp.eq.s32.totalorder %v905_v10, %v54_v17 }
  0x19   :  { %769 = vmatprep.subr.msk.mxu0 %vm80_vm4, %v871_v21  ;;  %777 = vmatprep.subr.msk.mxu1 %vm82_vm5, %v871_v21  ;;  %vm98_vm10 = vcmp.eq.s32.totalorder %v905_v10, %v62_v19  ;;  %vm95_vm11 = vcmp.eq.s32.totalorder %v905_v10, %v50_v18  ;;  %vm97_vm12 = vcmp.eq.s32.totalorder %v905_v10, %v58_v20 }
  0x1a   :  { %770 = vmatpush1.msk.msra.mxu0 %vm79_vm6, %v871_v21  ;;  %778 = vmatpush1.msk.msra.mxu1 %vm81_vm7, %v871_v21  ;;  %vm84_vm13 = vcmp.eq.s32.totalorder %v895_v2, %v54_v17  ;;  %vm86_vm14 = vcmp.eq.s32.totalorder %v895_v2, %v62_v19  ;;  %v70_v25 = vrot.slane %v27_v23, %v37_v3 }
  0x1b   :  { %771 = vmatmul.mubr.msk.f32.vlgmr.msra.gmra.mxu0 %vm155_vm8, %v927_v22  ;;  %779 = vmatmul.mubr.msk.f32.vlgmr.msra.gmra.mxu1 %vm155_vm8, %v927_v22  ;;  %v78_v26 = vrot.slane %v27_v23, %v45_v4  ;;  %vm83_vm15 = vcmp.eq.s32.totalorder %v895_v2, %v50_v18  ;;  %vm85_vm0 = vcmp.eq.s32.totalorder %v895_v2, %v58_v20 }
  0x1c   :  { %783 = vmatprep.subr.msk.mxu0 %vm96_vm9, %v871_v21  ;;  %791 = vmatprep.subr.msk.mxu1 %vm98_vm10, %v871_v21  ;;  %vm100_vm1 = vcmp.eq.s32.totalorder %v905_v10, %v70_v25  ;;  %v66_v29 = vrot.slane %v27_v23, %v33_v5  ;;  %v74_v30 = vrot.slane %v27_v23, %v41_v6 }
  0x1d   :  { %784 = vmatpush1.msk.msra.mxu0 %vm95_vm11, %v871_v21  ;;  %236 = vmatprep.mubr.f32.mxu0 %v870_v1  ;;  %vm102_vm2 = vcmp.eq.s32.totalorder %v905_v10, %v78_v26  ;;  %vm88_vm5 = vcmp.eq.s32.totalorder %v895_v2, %v70_v25  ;;  %vm90_vm6 = vcmp.eq.s32.totalorder %v895_v2, %v78_v26 }
  0x1e   :  { %324 = vmatprep.mubr.f32.mxu1 %v870_v1  ;;  %792 = vmatpush1.msk.msra.mxu1 %vm97_vm12, %v871_v21  ;;  %vm99_vm3 = vcmp.eq.s32.totalorder %v905_v10, %v66_v29  ;;  %vm101_vm4 = vcmp.eq.s32.totalorder %v905_v10, %v74_v30  ;;  %vm87_vm7 = vcmp.eq.s32.totalorder %v895_v2, %v66_v29 }
  0x1f   :  { %772 = vmatmul.mubr.msk.f32.gmra.mxu0 %vm155_vm8, %v946_v24  ;;  %780 = vmatmul.mubr.msk.f32.gmra.mxu1 %vm155_vm8, %v946_v24  ;;  %vm89_vm9 = vcmp.eq.s32.totalorder %v895_v2, %v74_v30 }
  0x20   :  { %242 = vmatprep.mubr.f32.mxu0 %v870_v1  ;;  %329 = vmatprep.mubr.f32.mxu1 %v870_v1 }
  0x21   :  { %785 = vmatprep.subr.msk.mxu0 %vm84_vm13, %v871_v21  ;;  %793 = vmatprep.subr.msk.mxu1 %vm86_vm14, %v871_v21 }
  0x22   :  { %786 = vmatpush1.msk.msra.mxu0 %vm83_vm15, %v871_v21  ;;  %794 = vmatpush1.msk.msra.mxu1 %vm85_vm0, %v871_v21 }
  0x23   :  { %773 = vmatmul.mubr.msk.f32.gmra.mxu0 %vm155_vm8, %v153_v27  ;;  %781 = vmatmul.mubr.msk.f32.gmra.mxu1 %vm155_vm8, %v153_v27 }
  0x24   :  { %248 = vmatprep.mubr.f32.mxu0 %v870_v1  ;;  %335 = vmatprep.mubr.f32.mxu1 %v870_v1 }
  0x25   :  { %799 = vmatprep.subr.msk.mxu0 %vm100_vm1, %v871_v21  ;;  %807 = vmatprep.subr.msk.mxu1 %vm102_vm2, %v871_v21 }
  0x27   :  { %774 = vmatmul.mubr.msk.f32.gmra.mxu0 %vm155_vm8, %v154_v28  ;;  %782 = vmatmul.mubr.msk.f32.gmra.mxu1 %vm155_vm8, %v154_v28 }
  0x28   :  { %406 = vmatprep.mubr.f32.mxu0 %v870_v1  ;;  %493 = vmatprep.mubr.f32.mxu1 %v870_v1 }
  0x2b   :  { %787 = vmatmul.mubr.msk.f32.vlgmr.msra.gmra.mxu0 %vm155_vm8, %v927_v22  ;;  %795 = vmatmul.mubr.msk.f32.vlgmr.msra.gmra.mxu1 %vm155_vm8, %v927_v22 }
  0x2c   :  { %800 = vmatpush1.msk.msra.mxu0 %vm99_vm3, %v871_v21  ;;  %412 = vmatprep.mubr.f32.mxu0 %v870_v1 }
  0x2d   :  { %499 = vmatprep.mubr.f32.mxu1 %v870_v1  ;;  %808 = vmatpush1.msk.msra.mxu1 %vm101_vm4, %v871_v21 }
  0x2e   :  { %801 = vmatprep.subr.msk.mxu0 %vm88_vm5, %v871_v21  ;;  %809 = vmatprep.subr.msk.mxu1 %vm90_vm6, %v871_v21 }
  0x2f   :  { %788 = vmatmul.mubr.msk.f32.gmra.mxu0 %vm155_vm8, %v946_v24  ;;  %796 = vmatmul.mubr.msk.f32.gmra.mxu1 %vm155_vm8, %v946_v24 }
  0x30   :  { %416 = vmatprep.mubr.f32.mxu0 %v870_v1  ;;  %505 = vmatprep.mubr.f32.mxu1 %v870_v1 }
  0x31   :  { %802 = vmatpush1.msk.msra.mxu0 %vm87_vm7, %v871_v21  ;;  %810 = vmatpush1.msk.msra.mxu1 %vm89_vm9, %v871_v21 }
  0x33   :  { %789 = vmatmul.mubr.msk.f32.gmra.mxu0 %vm155_vm8, %v153_v27  ;;  %797 = vmatmul.mubr.msk.f32.gmra.mxu1 %vm155_vm8, %v153_v27 }
  0x34   :  { %422 = vmatprep.mubr.f32.mxu0 %v870_v1  ;;  %509 = vmatprep.mubr.f32.mxu1 %v870_v1 }
  0x37   :  { %790 = vmatmul.mubr.msk.f32.gmra.mxu0 %vm155_vm8, %v154_v28  ;;  %798 = vmatmul.mubr.msk.f32.gmra.mxu1 %vm155_vm8, %v154_v28 }
  0x38   :  { %580 = vmatprep.mubr.f32.mxu0 %v870_v1  ;;  %667 = vmatprep.mubr.f32.mxu1 %v870_v1 }
  0x3b   :  { %803 = vmatmul.mubr.msk.f32.vlgmr.msra.gmra.mxu0 %vm155_vm8, %v927_v22  ;;  %811 = vmatmul.mubr.msk.f32.vlgmr.msra.gmra.mxu1 %vm155_vm8, %v927_v22 }
  0x3c   :  { %586 = vmatprep.mubr.f32.mxu0 %v870_v1  ;;  %673 = vmatprep.mubr.f32.mxu1 %v870_v1 }
  0x3f   :  { %804 = vmatmul.mubr.msk.f32.gmra.mxu0 %vm155_vm8, %v946_v24  ;;  %812 = vmatmul.mubr.msk.f32.gmra.mxu1 %vm155_vm8, %v946_v24 }
  0x40   :  { %592 = vmatprep.mubr.f32.mxu0 %v870_v1  ;;  %679 = vmatprep.mubr.f32.mxu1 %v870_v1 }
  0x43   :  { %805 = vmatmul.mubr.msk.f32.gmra.mxu0 %vm155_vm8, %v153_v27  ;;  %813 = vmatmul.mubr.msk.f32.gmra.mxu1 %vm155_vm8, %v153_v27 }
  0x44   :  { %597 = vmatprep.mubr.f32.mxu0 %v870_v1  ;;  %685 = vmatprep.mubr.f32.mxu1 %v870_v1 }
  0x47   :  { %806 = vmatmul.mubr.msk.f32.gmra.mxu0 %vm155_vm8, %v154_v28  ;;  %814 = vmatmul.mubr.msk.f32.gmra.mxu1 %vm155_vm8, %v154_v28 }
  0xdb   :  { %v234_v31 = vpop.f32.mrf.mxu0  ;;  %v321_v32 = vpop.f32.mrf.mxu1 }
  0xdd   :  { %v235_v33 = vpop.f32.mrf.mxu0  ;;  %v322_v34 = vpop.f32.mrf.mxu1 }
  0xdf   :  { %v238_v35 = vpop.f32.mrf.mxu0  ;;  %v326_v36 = vpop.f32.mrf.mxu1 }
  0xe0   :  { %v690_v37 = vmul.f32 %v322_v34, %v238_v35 }
  0xe1   :  { %v240_v38 = vpop.f32.mrf.mxu0  ;;  %v328_v39 = vpop.f32.mrf.mxu1 }
  0xe2   :  { %708 = vst [vmem:[#allocation5] sm:$0xff] %v690_v37 }
  0xe3   :  { %v244_v40 = vpop.f32.mrf.mxu0  ;;  %v331_v41 = vpop.f32.mrf.mxu1 }
  0xe5   :  { %v246_v42 = vpop.f32.mrf.mxu0  ;;  %v333_v43 = vpop.f32.mrf.mxu1 }
  0xe7   :  { %v250_v44 = vpop.f32.mrf.mxu0  ;;  %v337_v45 = vpop.f32.mrf.mxu1 }
  0xe9   :  { %v252_v46 = vpop.f32.mrf.mxu0  ;;  %v339_v47 = vpop.f32.mrf.mxu1 }
  0xeb   :  { %v408_v48 = vpop.f32.mrf.mxu0  ;;  %v495_v49 = vpop.f32.mrf.mxu1 }
  0xec   :  { %v691_v50 = vmul.f32 %v408_v48, %v240_v38  ;;  %v693_v51 = vmul.f32 %v495_v49, %v244_v40 }
  0xed   :  { %v410_v52 = vpop.f32.mrf.mxu0  ;;  %v497_v53 = vpop.f32.mrf.mxu1 }
  0xee   :  { %709 = vst [vmem:[#allocation5 + $0x8] sm:$0xff] %v691_v50  ;;  %711 = vst [vmem:[#allocation5 + $0x18] sm:$0xff] %v693_v51  ;;  %v692_v54 = vmul.f32 %v410_v52, %v326_v36  ;;  %v694_v55 = vmul.f32 %v497_v53, %v246_v42 }
  0xef   :  { %v414_v56 = vpop.f32.mrf.mxu0  ;;  %v501_v57 = vpop.f32.mrf.mxu1 }
  0xf0   :  { %710 = vst [vmem:[#allocation5 + $0x10] sm:$0xff] %v692_v54  ;;  %712 = vst [vmem:[#allocation5 + $0x20] sm:$0xff] %v694_v55  ;;  %v699_v58 = vmul.f32 %v501_v57, %v333_v43 }
  0xf1   :  { %v415_v59 = vpop.f32.mrf.mxu0  ;;  %v503_v60 = vpop.f32.mrf.mxu1 }
  0xf2   :  { %717 = vst [vmem:[#allocation5 + $0x48] sm:$0xff] %v699_v58 }
  0xf3   :  { %v418_v61 = vpop.f32.mrf.mxu0  ;;  %v507_v62 = vpop.f32.mrf.mxu1 }
  0xf4   :  { %v700_v63 = vmul.f32 %v503_v60, %v418_v61 }
  0xf5   :  { %v420_v0 = vpop.f32.mrf.mxu0  ;;  %v508_v1 = vpop.f32.mrf.mxu1 }
  0xf6   :  { %718 = vst [vmem:[#allocation5 + $0x50] sm:$0xff] %v700_v63 }
  0xf7   :  { %v424_v2 = vpop.f32.mrf.mxu0  ;;  %v511_v3 = vpop.f32.mrf.mxu1 }
  0xf9   :  { %v426_v4 = vpop.f32.mrf.mxu0  ;;  %v513_v5 = vpop.f32.mrf.mxu1 }
  0xfb   :  { %v582_v6 = vpop.f32.mrf.mxu0  ;;  %v669_v7 = vpop.f32.mrf.mxu1 }
  0xfc   :  { %v695_v8 = vmul.f32 %v582_v6, %v331_v41  ;;  %v697_v9 = vmul.f32 %v669_v7, %v252_v46 }
  0xfd   :  { %v584_v10 = vpop.f32.mrf.mxu0  ;;  %v671_v11 = vpop.f32.mrf.mxu1 }
  0xfe   :  { %713 = vst [vmem:[#allocation5 + $0x28] sm:$0xff] %v695_v8  ;;  %715 = vst [vmem:[#allocation5 + $0x38] sm:$0xff] %v697_v9  ;;  %v696_v12 = vmul.f32 %v584_v10, %v250_v44  ;;  %v698_v13 = vmul.f32 %v671_v11, %v337_v45 }
  0xff   :  { %v588_v14 = vpop.f32.mrf.mxu0  ;;  %v675_v15 = vpop.f32.mrf.mxu1 }
 0x100   :  { %714 = vst [vmem:[#allocation5 + $0x30] sm:$0xff] %v696_v12  ;;  %716 = vst [vmem:[#allocation5 + $0x40] sm:$0xff] %v698_v13  ;;  %v701_v16 = vmul.f32 %v588_v14, %v420_v0  ;;  %v703_v17 = vmul.f32 %v675_v15, %v424_v2 }
 0x101   :  { %v590_v18 = vpop.f32.mrf.mxu0  ;;  %v677_v19 = vpop.f32.mrf.mxu1 }
 0x102   :  { %719 = vst [vmem:[#allocation5 + $0x58] sm:$0xff] %v701_v16  ;;  %721 = vst [vmem:[#allocation5 + $0x68] sm:$0xff] %v703_v17  ;;  %v702_v20 = vmul.f32 %v590_v18, %v339_v47  ;;  %v704_v21 = vmul.f32 %v677_v19, %v426_v4 }
 0x103   :  { %v594_v22 = vpop.f32.mrf.mxu0  ;;  %v681_v23 = vpop.f32.mrf.mxu1 }
 0x104   :  { %720 = vst [vmem:[#allocation5 + $0x60] sm:$0xff] %v702_v20  ;;  %722 = vst [vmem:[#allocation5 + $0x70] sm:$0xff] %v704_v21  ;;  %v706_v24 = vmul.f32 %v681_v23, %v513_v5 }
 0x105   :  { %v595_v25 = vpop.f32.mrf.mxu0  ;;  %v683_v26 = vpop.f32.mrf.mxu1 }
 0x106   :  { %724 = vst [vmem:[#allocation5 + $0x80] sm:$0xff] %v706_v24  ;;  %v705_v27 = vmul.f32 %v595_v25, %v511_v3 }
 0x107   :  { %v599_v28 = vpop.f32.mrf.mxu0  ;;  %v687_v29 = vpop.f32.mrf.mxu1 }
 0x108   :  { %723 = vst [vmem:[#allocation5 + $0x78] sm:$0xff] %v705_v27  ;;  %v707_v30 = vmul.f32 %v683_v26, %v599_v28 }
 0x109   :  { %v601_v31 = vpop.f32.mrf.mxu0  ;;  %v688_v32 = vpop.f32.mrf.mxu1 }
 0x10a   :  { %725 = vst [vmem:[#allocation5 + $0x88] sm:$0xff] %v707_v30 }
 0x10b   :  { %854 = shalt.err (!%p851_p9)
}
 0x10c   :  { %s873_s21 = smov 384   ;;  %s874_s22 = smov 24  }
 0x10d   :  { %737 = dma.vmem_to_hbm [thread:$0]  %s732_s19, 2304, %s1037_s2, [#allocation4], %s873_s21, %s873_s21, %s874_s22  }
 0x10e   :  { %865 = dma.done.wait [#allocation4], 2304  }
 0x10f   :  { %866 = vsyncadd [#allocation4], 4294964992 }
 0x110   :  { %741 = vsyncpa [#allocation3], 1 }
 0x111   :  { %742 = vsyncpa [#allocation4], 1 }

</bundles_post_ra>
